<compile_context>
chip_gen: v5e
topology: v5e:2x2
jax: 0.10.0
libtpu: 0.0.40
codegen_flags: <defaults>
</compile_context>

<pallas_src>
import jax
import jax.numpy as jnp
from jax import lax
from jax.experimental import pallas as pl
from jax.experimental.pallas import tpu as pltpu


def _ad_sentiment_kernel(ids_ref, len_ref, emb_ref,
                         wih_ref, whh_ref, b_ref,
                         wo_ref, bo_ref,
                         w1_ref, b1_ref,
                         w2_ref, b2_ref,
                         out_ref):
    TB = ids_ref.shape[0]
    V, D = emb_ref.shape
    H = whh_ref.shape[0]
    B = len_ref.shape[0]
    T = TB // B

    # ---- Embedding gather (one-hot MXU matmul) + input projection, hoisted
    # out of the recurrence:  Zx = onehot(tokens) @ emb @ W_ih + (b_ih+b_hh) ---
    ids = ids_ref[...]                                              # (T*B, 1) int32, t-major rows
    onehot = (ids == lax.broadcasted_iota(jnp.int32, (TB, V), 1)).astype(jnp.float32)
    x = jnp.dot(onehot, emb_ref[...], preferred_element_type=jnp.float32)        # (T*B, D)
    zx = jnp.dot(x, wih_ref[...], preferred_element_type=jnp.float32) + b_ref[...]  # (T*B, 4H)

    whh = whh_ref[...]                                              # (H, 4H)
    lengths = len_ref[...]                                          # (B, 1) int32

    h = jnp.zeros((B, H), jnp.float32)
    c = jnp.zeros((B, H), jnp.float32)

    # Fully unrolled recurrence (T is a small static constant); one MXU push
    # per step, static slices of the precomputed Zx.
    for t in range(T):
        z = zx[t * B:(t + 1) * B, :] + jnp.dot(h, whh, preferred_element_type=jnp.float32)
        zs = jax.nn.sigmoid(z)                                      # full-width (B, 4H)
        zt = jnp.tanh(z)                                            # full-width (B, 4H)
        i_g = zs[:, 0 * H:1 * H]                                    # torch gate order i, f, g, o
        f_g = zs[:, 1 * H:2 * H]
        g_g = zt[:, 2 * H:3 * H]
        o_g = zs[:, 3 * H:4 * H]
        c_new = f_g * c + i_g * g_g
        h_new = o_g * jnp.tanh(c_new)
        # pack_padded_sequence semantics: freeze state once t >= length
        valid = jnp.broadcast_to(lengths > t, (B, H))
        c = jnp.where(valid, c_new, c)
        h = jnp.where(valid, h_new, h)

    # other_hidden projection (hidden_size -> input_size)
    other = jnp.dot(h, wo_ref[...], preferred_element_type=jnp.float32) + bo_ref[...]

    # Discriminator: Linear -> ReLU -> Dropout(eval: identity) -> Linear
    h1 = jnp.maximum(
        jnp.dot(other, w1_ref[...], preferred_element_type=jnp.float32) + b1_ref[...],
        0.0)
    logits = jnp.dot(h1, w2_ref[...], preferred_element_type=jnp.float32) + b2_ref[...]

    out_ref[...] = jax.nn.sigmoid(logits)


def ad_sentiment_forward(token_ids, lengths, params):
    B, T = token_ids.shape
    out_dim = params["w2"].shape[1]
    # t-major flat token ids: row t*B + b holds token_ids[b, t] (tiny int op;
    # lets the kernel slice the precomputed Zx per step with a static slice).
    ids_tb = jnp.transpose(token_ids).reshape(T * B, 1).astype(jnp.int32)
    lengths2d = lengths.reshape(B, 1).astype(jnp.int32)

    args = (ids_tb, lengths2d, params["embedding"],
            params["wih"], params["whh"], params["b_lstm"],
            params["wo"], params["bo"],
            params["w1"], params["b1"],
            params["w2"], params["b2"])

    return pl.pallas_call(
        _ad_sentiment_kernel,
        out_shape=jax.ShapeDtypeStruct((B, out_dim), jnp.float32),
        in_specs=[pl.BlockSpec(memory_space=pltpu.MemorySpace.VMEM)] * len(args),
        out_specs=pl.BlockSpec(memory_space=pltpu.MemorySpace.VMEM),
    )(*args)


def init_params(key, vocab_size, input_size, hidden_size, output_size):
    D, H = input_size, hidden_size
    ks = jax.random.split(key, 10)

    def w(k, shape, scale):
        return jax.random.normal(k, shape, jnp.float32) * scale

    return dict(
        embedding=w(ks[0], (vocab_size, D), 0.1),
        wih=w(ks[1], (D, 4 * H), 1.0 / (D ** 0.5)),
        whh=w(ks[2], (H, 4 * H), 1.0 / (H ** 0.5)),
        b_lstm=w(ks[3], (1, 4 * H), 0.01),
        wo=w(ks[4], (H, D), 1.0 / (H ** 0.5)),
        bo=w(ks[5], (1, D), 0.01),
        w1=w(ks[6], (D, H), 1.0 / (D ** 0.5)),
        b1=w(ks[7], (1, H), 0.01),
        w2=w(ks[8], (H, output_size), 1.0 / (H ** 0.5)),
        b2=w(ks[9], (1, output_size), 0.01),
    )


def reference_forward(token_ids, lengths, params):
    """Pure-JAX reference for verification."""
    x = jnp.take(params["embedding"], token_ids, axis=0)
    B, T, D = x.shape
    H = params["whh"].shape[0]
    h = jnp.zeros((B, H), jnp.float32)
    c = jnp.zeros((B, H), jnp.float32)
    for t in range(T):
        z = x[:, t] @ params["wih"] + h @ params["whh"] + params["b_lstm"]
        i = jax.nn.sigmoid(z[:, :H])
        f = jax.nn.sigmoid(z[:, H:2 * H])
        g = jnp.tanh(z[:, 2 * H:3 * H])
        o = jax.nn.sigmoid(z[:, 3 * H:])
        c_new = f * c + i * g
        h_new = o * jnp.tanh(c_new)
        m = (t < lengths)[:, None].astype(jnp.float32)
        h = m * h_new + (1.0 - m) * h
        c = m * c_new + (1.0 - m) * c
    other = h @ params["wo"] + params["bo"]
    h1 = jax.nn.relu(other @ params["w1"] + params["b1"])
    return jax.nn.sigmoid(h1 @ params["w2"] + params["b2"])


if __name__ == "__main__":
    # Small, module-consistent shapes
    B, T = 8, 8                 # batch, max_len
    vocab_size = 32
    input_size = 16
    hidden_size = 32
    output_size = 2

    key = jax.random.PRNGKey(0)
    k_tok, k_len, k_par = jax.random.split(key, 3)

    token_ids = jax.random.randint(k_tok, (B, T), 0, vocab_size, dtype=jnp.int32)
    lengths = jax.random.randint(k_len, (B,), 1, T + 1, dtype=jnp.int32)
    params = init_params(k_par, vocab_size, input_size, hidden_size, output_size)

    out = ad_sentiment_forward(token_ids, lengths, params)
    out = jax.block_until_ready(out)

    ref = reference_forward(token_ids, lengths, params)
    assert out.shape == (B, output_size)
    assert jnp.allclose(out, ref, atol=1e-5, rtol=1e-5), "mismatch vs pure-JAX reference"

    print("KERNEL_OK")
</pallas_src>

<mosaic_0001>
module attributes {stable_mosaic.version = 11 : i64} {
  func.func @_ad_sentiment_kernel(%arg0: memref<64x1xi32, #tpu.memory_space<vmem>>, %arg1: memref<8x1xi32, #tpu.memory_space<vmem>>, %arg2: memref<32x16xf32, #tpu.memory_space<vmem>>, %arg3: memref<16x128xf32, #tpu.memory_space<vmem>>, %arg4: memref<32x128xf32, #tpu.memory_space<vmem>>, %arg5: memref<1x128xf32, #tpu.memory_space<vmem>>, %arg6: memref<32x16xf32, #tpu.memory_space<vmem>>, %arg7: memref<1x16xf32, #tpu.memory_space<vmem>>, %arg8: memref<16x32xf32, #tpu.memory_space<vmem>>, %arg9: memref<1x32xf32, #tpu.memory_space<vmem>>, %arg10: memref<32x2xf32, #tpu.memory_space<vmem>>, %arg11: memref<1x2xf32, #tpu.memory_space<vmem>>, %arg12: memref<8x2xf32, #tpu.memory_space<vmem>>) attributes {dimension_semantics = [], scalar_prefetch = 0 : i64, scratch_operands = 0 : i64, tpu.core_type = #tpu.core_type<tc>} {
    %c0 = arith.constant 0 : index
    %c0_0 = arith.constant 0 : index
    %0 = vector.load %arg0[%c0, %c0_0] : memref<64x1xi32, #tpu.memory_space<vmem>>, vector<64x1xi32>
    %1 = tpu.iota {dimensions = array<i32: 1>} : vector<64x32xi32>
    %2 = vector.broadcast %0 : vector<64x1xi32> to vector<64x32xi32>
    %3 = arith.cmpi eq, %2, %1 : vector<64x32xi32>
    %4 = arith.extui %3 : vector<64x32xi1> to vector<64x32xi32>
    %5 = arith.sitofp %4 : vector<64x32xi32> to vector<64x32xf32>
    %c0_1 = arith.constant 0 : index
    %c0_2 = arith.constant 0 : index
    %6 = vector.load %arg2[%c0_1, %c0_2] : memref<32x16xf32, #tpu.memory_space<vmem>>, vector<32x16xf32>
    %cst = arith.constant dense<0.000000e+00> : vector<64x16xf32>
    %7 = tpu.matmul %5, %6, %cst {dimension_numbers = #tpu.dot_dimension_numbers<[1], [0], [0], [1], [0, 0, 1, 1], [], []>} : vector<64x32xf32>, vector<32x16xf32>, vector<64x16xf32> -> vector<64x16xf32>
    %c0_3 = arith.constant 0 : index
    %c0_4 = arith.constant 0 : index
    %8 = vector.load %arg3[%c0_3, %c0_4] : memref<16x128xf32, #tpu.memory_space<vmem>>, vector<16x128xf32>
    %cst_5 = arith.constant dense<0.000000e+00> : vector<64x128xf32>
    %9 = tpu.matmul %7, %8, %cst_5 {dimension_numbers = #tpu.dot_dimension_numbers<[1], [0], [0], [1], [0, 0, 1, 1], [], []>} : vector<64x16xf32>, vector<16x128xf32>, vector<64x128xf32> -> vector<64x128xf32>
    %c0_6 = arith.constant 0 : index
    %c0_7 = arith.constant 0 : index
    %10 = vector.load %arg5[%c0_6, %c0_7] : memref<1x128xf32, #tpu.memory_space<vmem>>, vector<1x128xf32>
    %11 = vector.broadcast %10 : vector<1x128xf32> to vector<64x128xf32>
    %12 = arith.addf %9, %11 : vector<64x128xf32>
    %c0_8 = arith.constant 0 : index
    %c0_9 = arith.constant 0 : index
    %13 = vector.load %arg4[%c0_8, %c0_9] : memref<32x128xf32, #tpu.memory_space<vmem>>, vector<32x128xf32>
    %c0_10 = arith.constant 0 : index
    %c0_11 = arith.constant 0 : index
    %14 = vector.load %arg1[%c0_10, %c0_11] : memref<8x1xi32, #tpu.memory_space<vmem>>, vector<8x1xi32>
    %cst_12 = arith.constant 0.000000e+00 : f32
    %15 = vector.broadcast %cst_12 : f32 to vector<8x32xf32>
    %cst_13 = arith.constant 0.000000e+00 : f32
    %16 = vector.broadcast %cst_13 : f32 to vector<8x32xf32>
    %17 = vector.extract_strided_slice %12 {offsets = [0, 0], sizes = [8, 128], strides = [1, 1]} : vector<64x128xf32> to vector<8x128xf32>
    %cst_14 = arith.constant dense<0.000000e+00> : vector<8x128xf32>
    %18 = tpu.matmul %15, %13, %cst_14 {dimension_numbers = #tpu.dot_dimension_numbers<[1], [0], [0], [1], [0, 0, 1, 1], [], []>} : vector<8x32xf32>, vector<32x128xf32>, vector<8x128xf32> -> vector<8x128xf32>
    %19 = arith.addf %17, %18 : vector<8x128xf32>
    %20 = arith.negf %19 : vector<8x128xf32>
    %21 = math.exp %20 : vector<8x128xf32>
    %cst_15 = arith.constant 1.000000e+00 : f32
    %22 = vector.broadcast %cst_15 : f32 to vector<8x128xf32>
    %23 = arith.addf %22, %21 : vector<8x128xf32>
    %24 = arith.divf %22, %23 : vector<8x128xf32>
    %25 = math.tanh %19 : vector<8x128xf32>
    %26 = vector.extract_strided_slice %24 {offsets = [0, 0], sizes = [8, 32], strides = [1, 1]} : vector<8x128xf32> to vector<8x32xf32>
    %27 = vector.extract_strided_slice %24 {offsets = [0, 32], sizes = [8, 32], strides = [1, 1]} : vector<8x128xf32> to vector<8x32xf32>
    %28 = vector.extract_strided_slice %25 {offsets = [0, 64], sizes = [8, 32], strides = [1, 1]} : vector<8x128xf32> to vector<8x32xf32>
    %29 = vector.extract_strided_slice %24 {offsets = [0, 96], sizes = [8, 32], strides = [1, 1]} : vector<8x128xf32> to vector<8x32xf32>
    %30 = arith.mulf %27, %16 : vector<8x32xf32>
    %31 = arith.mulf %26, %28 : vector<8x32xf32>
    %32 = arith.addf %30, %31 : vector<8x32xf32>
    %33 = math.tanh %32 : vector<8x32xf32>
    %34 = arith.mulf %29, %33 : vector<8x32xf32>
    %c0_i32 = arith.constant 0 : i32
    %35 = vector.broadcast %c0_i32 : i32 to vector<8x1xi32>
    %36 = arith.cmpi sgt, %14, %35 : vector<8x1xi32>
    %37 = vector.shape_cast %36 : vector<8x1xi1> to vector<8x1xi1>
    %38 = vector.broadcast %37 : vector<8x1xi1> to vector<8x32xi1>
    %39 = arith.select %38, %32, %16 : vector<8x32xi1>, vector<8x32xf32>
    %40 = arith.select %38, %34, %15 : vector<8x32xi1>, vector<8x32xf32>
    %41 = vector.extract_strided_slice %12 {offsets = [8, 0], sizes = [8, 128], strides = [1, 1]} : vector<64x128xf32> to vector<8x128xf32>
    %cst_16 = arith.constant dense<0.000000e+00> : vector<8x128xf32>
    %42 = tpu.matmul %40, %13, %cst_16 {dimension_numbers = #tpu.dot_dimension_numbers<[1], [0], [0], [1], [0, 0, 1, 1], [], []>} : vector<8x32xf32>, vector<32x128xf32>, vector<8x128xf32> -> vector<8x128xf32>
    %43 = arith.addf %41, %42 : vector<8x128xf32>
    %44 = arith.negf %43 : vector<8x128xf32>
    %45 = math.exp %44 : vector<8x128xf32>
    %cst_17 = arith.constant 1.000000e+00 : f32
    %46 = vector.broadcast %cst_17 : f32 to vector<8x128xf32>
    %47 = arith.addf %46, %45 : vector<8x128xf32>
    %48 = arith.divf %46, %47 : vector<8x128xf32>
    %49 = math.tanh %43 : vector<8x128xf32>
    %50 = vector.extract_strided_slice %48 {offsets = [0, 0], sizes = [8, 32], strides = [1, 1]} : vector<8x128xf32> to vector<8x32xf32>
    %51 = vector.extract_strided_slice %48 {offsets = [0, 32], sizes = [8, 32], strides = [1, 1]} : vector<8x128xf32> to vector<8x32xf32>
    %52 = vector.extract_strided_slice %49 {offsets = [0, 64], sizes = [8, 32], strides = [1, 1]} : vector<8x128xf32> to vector<8x32xf32>
    %53 = vector.extract_strided_slice %48 {offsets = [0, 96], sizes = [8, 32], strides = [1, 1]} : vector<8x128xf32> to vector<8x32xf32>
    %54 = arith.mulf %51, %39 : vector<8x32xf32>
    %55 = arith.mulf %50, %52 : vector<8x32xf32>
    %56 = arith.addf %54, %55 : vector<8x32xf32>
    %57 = math.tanh %56 : vector<8x32xf32>
    %58 = arith.mulf %53, %57 : vector<8x32xf32>
    %c1_i32 = arith.constant 1 : i32
    %59 = vector.broadcast %c1_i32 : i32 to vector<8x1xi32>
    %60 = arith.cmpi sgt, %14, %59 : vector<8x1xi32>
    %61 = vector.shape_cast %60 : vector<8x1xi1> to vector<8x1xi1>
    %62 = vector.broadcast %61 : vector<8x1xi1> to vector<8x32xi1>
    %63 = arith.select %62, %56, %39 : vector<8x32xi1>, vector<8x32xf32>
    %64 = arith.select %62, %58, %40 : vector<8x32xi1>, vector<8x32xf32>
    %65 = vector.extract_strided_slice %12 {offsets = [16, 0], sizes = [8, 128], strides = [1, 1]} : vector<64x128xf32> to vector<8x128xf32>
    %cst_18 = arith.constant dense<0.000000e+00> : vector<8x128xf32>
    %66 = tpu.matmul %64, %13, %cst_18 {dimension_numbers = #tpu.dot_dimension_numbers<[1], [0], [0], [1], [0, 0, 1, 1], [], []>} : vector<8x32xf32>, vector<32x128xf32>, vector<8x128xf32> -> vector<8x128xf32>
    %67 = arith.addf %65, %66 : vector<8x128xf32>
    %68 = arith.negf %67 : vector<8x128xf32>
    %69 = math.exp %68 : vector<8x128xf32>
    %cst_19 = arith.constant 1.000000e+00 : f32
    %70 = vector.broadcast %cst_19 : f32 to vector<8x128xf32>
    %71 = arith.addf %70, %69 : vector<8x128xf32>
    %72 = arith.divf %70, %71 : vector<8x128xf32>
    %73 = math.tanh %67 : vector<8x128xf32>
    %74 = vector.extract_strided_slice %72 {offsets = [0, 0], sizes = [8, 32], strides = [1, 1]} : vector<8x128xf32> to vector<8x32xf32>
    %75 = vector.extract_strided_slice %72 {offsets = [0, 32], sizes = [8, 32], strides = [1, 1]} : vector<8x128xf32> to vector<8x32xf32>
    %76 = vector.extract_strided_slice %73 {offsets = [0, 64], sizes = [8, 32], strides = [1, 1]} : vector<8x128xf32> to vector<8x32xf32>
    %77 = vector.extract_strided_slice %72 {offsets = [0, 96], sizes = [8, 32], strides = [1, 1]} : vector<8x128xf32> to vector<8x32xf32>
    %78 = arith.mulf %75, %63 : vector<8x32xf32>
    %79 = arith.mulf %74, %76 : vector<8x32xf32>
    %80 = arith.addf %78, %79 : vector<8x32xf32>
    %81 = math.tanh %80 : vector<8x32xf32>
    %82 = arith.mulf %77, %81 : vector<8x32xf32>
    %c2_i32 = arith.constant 2 : i32
    %83 = vector.broadcast %c2_i32 : i32 to vector<8x1xi32>
    %84 = arith.cmpi sgt, %14, %83 : vector<8x1xi32>
    %85 = vector.shape_cast %84 : vector<8x1xi1> to vector<8x1xi1>
    %86 = vector.broadcast %85 : vector<8x1xi1> to vector<8x32xi1>
    %87 = arith.select %86, %80, %63 : vector<8x32xi1>, vector<8x32xf32>
    %88 = arith.select %86, %82, %64 : vector<8x32xi1>, vector<8x32xf32>
    %89 = vector.extract_strided_slice %12 {offsets = [24, 0], sizes = [8, 128], strides = [1, 1]} : vector<64x128xf32> to vector<8x128xf32>
    %cst_20 = arith.constant dense<0.000000e+00> : vector<8x128xf32>
    %90 = tpu.matmul %88, %13, %cst_20 {dimension_numbers = #tpu.dot_dimension_numbers<[1], [0], [0], [1], [0, 0, 1, 1], [], []>} : vector<8x32xf32>, vector<32x128xf32>, vector<8x128xf32> -> vector<8x128xf32>
    %91 = arith.addf %89, %90 : vector<8x128xf32>
    %92 = arith.negf %91 : vector<8x128xf32>
    %93 = math.exp %92 : vector<8x128xf32>
    %cst_21 = arith.constant 1.000000e+00 : f32
    %94 = vector.broadcast %cst_21 : f32 to vector<8x128xf32>
    %95 = arith.addf %94, %93 : vector<8x128xf32>
    %96 = arith.divf %94, %95 : vector<8x128xf32>
    %97 = math.tanh %91 : vector<8x128xf32>
    %98 = vector.extract_strided_slice %96 {offsets = [0, 0], sizes = [8, 32], strides = [1, 1]} : vector<8x128xf32> to vector<8x32xf32>
    %99 = vector.extract_strided_slice %96 {offsets = [0, 32], sizes = [8, 32], strides = [1, 1]} : vector<8x128xf32> to vector<8x32xf32>
    %100 = vector.extract_strided_slice %97 {offsets = [0, 64], sizes = [8, 32], strides = [1, 1]} : vector<8x128xf32> to vector<8x32xf32>
    %101 = vector.extract_strided_slice %96 {offsets = [0, 96], sizes = [8, 32], strides = [1, 1]} : vector<8x128xf32> to vector<8x32xf32>
    %102 = arith.mulf %99, %87 : vector<8x32xf32>
    %103 = arith.mulf %98, %100 : vector<8x32xf32>
    %104 = arith.addf %102, %103 : vector<8x32xf32>
    %105 = math.tanh %104 : vector<8x32xf32>
    %106 = arith.mulf %101, %105 : vector<8x32xf32>
    %c3_i32 = arith.constant 3 : i32
    %107 = vector.broadcast %c3_i32 : i32 to vector<8x1xi32>
    %108 = arith.cmpi sgt, %14, %107 : vector<8x1xi32>
    %109 = vector.shape_cast %108 : vector<8x1xi1> to vector<8x1xi1>
    %110 = vector.broadcast %109 : vector<8x1xi1> to vector<8x32xi1>
    %111 = arith.select %110, %104, %87 : vector<8x32xi1>, vector<8x32xf32>
    %112 = arith.select %110, %106, %88 : vector<8x32xi1>, vector<8x32xf32>
    %113 = vector.extract_strided_slice %12 {offsets = [32, 0], sizes = [8, 128], strides = [1, 1]} : vector<64x128xf32> to vector<8x128xf32>
    %cst_22 = arith.constant dense<0.000000e+00> : vector<8x128xf32>
    %114 = tpu.matmul %112, %13, %cst_22 {dimension_numbers = #tpu.dot_dimension_numbers<[1], [0], [0], [1], [0, 0, 1, 1], [], []>} : vector<8x32xf32>, vector<32x128xf32>, vector<8x128xf32> -> vector<8x128xf32>
    %115 = arith.addf %113, %114 : vector<8x128xf32>
    %116 = arith.negf %115 : vector<8x128xf32>
    %117 = math.exp %116 : vector<8x128xf32>
    %cst_23 = arith.constant 1.000000e+00 : f32
    %118 = vector.broadcast %cst_23 : f32 to vector<8x128xf32>
    %119 = arith.addf %118, %117 : vector<8x128xf32>
    %120 = arith.divf %118, %119 : vector<8x128xf32>
    %121 = math.tanh %115 : vector<8x128xf32>
    %122 = vector.extract_strided_slice %120 {offsets = [0, 0], sizes = [8, 32], strides = [1, 1]} : vector<8x128xf32> to vector<8x32xf32>
    %123 = vector.extract_strided_slice %120 {offsets = [0, 32], sizes = [8, 32], strides = [1, 1]} : vector<8x128xf32> to vector<8x32xf32>
    %124 = vector.extract_strided_slice %121 {offsets = [0, 64], sizes = [8, 32], strides = [1, 1]} : vector<8x128xf32> to vector<8x32xf32>
    %125 = vector.extract_strided_slice %120 {offsets = [0, 96], sizes = [8, 32], strides = [1, 1]} : vector<8x128xf32> to vector<8x32xf32>
    %126 = arith.mulf %123, %111 : vector<8x32xf32>
    %127 = arith.mulf %122, %124 : vector<8x32xf32>
    %128 = arith.addf %126, %127 : vector<8x32xf32>
    %129 = math.tanh %128 : vector<8x32xf32>
    %130 = arith.mulf %125, %129 : vector<8x32xf32>
    %c4_i32 = arith.constant 4 : i32
    %131 = vector.broadcast %c4_i32 : i32 to vector<8x1xi32>
    %132 = arith.cmpi sgt, %14, %131 : vector<8x1xi32>
    %133 = vector.shape_cast %132 : vector<8x1xi1> to vector<8x1xi1>
    %134 = vector.broadcast %133 : vector<8x1xi1> to vector<8x32xi1>
    %135 = arith.select %134, %128, %111 : vector<8x32xi1>, vector<8x32xf32>
    %136 = arith.select %134, %130, %112 : vector<8x32xi1>, vector<8x32xf32>
    %137 = vector.extract_strided_slice %12 {offsets = [40, 0], sizes = [8, 128], strides = [1, 1]} : vector<64x128xf32> to vector<8x128xf32>
    %cst_24 = arith.constant dense<0.000000e+00> : vector<8x128xf32>
    %138 = tpu.matmul %136, %13, %cst_24 {dimension_numbers = #tpu.dot_dimension_numbers<[1], [0], [0], [1], [0, 0, 1, 1], [], []>} : vector<8x32xf32>, vector<32x128xf32>, vector<8x128xf32> -> vector<8x128xf32>
    %139 = arith.addf %137, %138 : vector<8x128xf32>
    %140 = arith.negf %139 : vector<8x128xf32>
    %141 = math.exp %140 : vector<8x128xf32>
    %cst_25 = arith.constant 1.000000e+00 : f32
    %142 = vector.broadcast %cst_25 : f32 to vector<8x128xf32>
    %143 = arith.addf %142, %141 : vector<8x128xf32>
    %144 = arith.divf %142, %143 : vector<8x128xf32>
    %145 = math.tanh %139 : vector<8x128xf32>
    %146 = vector.extract_strided_slice %144 {offsets = [0, 0], sizes = [8, 32], strides = [1, 1]} : vector<8x128xf32> to vector<8x32xf32>
    %147 = vector.extract_strided_slice %144 {offsets = [0, 32], sizes = [8, 32], strides = [1, 1]} : vector<8x128xf32> to vector<8x32xf32>
    %148 = vector.extract_strided_slice %145 {offsets = [0, 64], sizes = [8, 32], strides = [1, 1]} : vector<8x128xf32> to vector<8x32xf32>
    %149 = vector.extract_strided_slice %144 {offsets = [0, 96], sizes = [8, 32], strides = [1, 1]} : vector<8x128xf32> to vector<8x32xf32>
    %150 = arith.mulf %147, %135 : vector<8x32xf32>
    %151 = arith.mulf %146, %148 : vector<8x32xf32>
    %152 = arith.addf %150, %151 : vector<8x32xf32>
    %153 = math.tanh %152 : vector<8x32xf32>
    %154 = arith.mulf %149, %153 : vector<8x32xf32>
    %c5_i32 = arith.constant 5 : i32
    %155 = vector.broadcast %c5_i32 : i32 to vector<8x1xi32>
    %156 = arith.cmpi sgt, %14, %155 : vector<8x1xi32>
    %157 = vector.shape_cast %156 : vector<8x1xi1> to vector<8x1xi1>
    %158 = vector.broadcast %157 : vector<8x1xi1> to vector<8x32xi1>
    %159 = arith.select %158, %152, %135 : vector<8x32xi1>, vector<8x32xf32>
    %160 = arith.select %158, %154, %136 : vector<8x32xi1>, vector<8x32xf32>
    %161 = vector.extract_strided_slice %12 {offsets = [48, 0], sizes = [8, 128], strides = [1, 1]} : vector<64x128xf32> to vector<8x128xf32>
    %cst_26 = arith.constant dense<0.000000e+00> : vector<8x128xf32>
    %162 = tpu.matmul %160, %13, %cst_26 {dimension_numbers = #tpu.dot_dimension_numbers<[1], [0], [0], [1], [0, 0, 1, 1], [], []>} : vector<8x32xf32>, vector<32x128xf32>, vector<8x128xf32> -> vector<8x128xf32>
    %163 = arith.addf %161, %162 : vector<8x128xf32>
    %164 = arith.negf %163 : vector<8x128xf32>
    %165 = math.exp %164 : vector<8x128xf32>
    %cst_27 = arith.constant 1.000000e+00 : f32
    %166 = vector.broadcast %cst_27 : f32 to vector<8x128xf32>
    %167 = arith.addf %166, %165 : vector<8x128xf32>
    %168 = arith.divf %166, %167 : vector<8x128xf32>
    %169 = math.tanh %163 : vector<8x128xf32>
    %170 = vector.extract_strided_slice %168 {offsets = [0, 0], sizes = [8, 32], strides = [1, 1]} : vector<8x128xf32> to vector<8x32xf32>
    %171 = vector.extract_strided_slice %168 {offsets = [0, 32], sizes = [8, 32], strides = [1, 1]} : vector<8x128xf32> to vector<8x32xf32>
    %172 = vector.extract_strided_slice %169 {offsets = [0, 64], sizes = [8, 32], strides = [1, 1]} : vector<8x128xf32> to vector<8x32xf32>
    %173 = vector.extract_strided_slice %168 {offsets = [0, 96], sizes = [8, 32], strides = [1, 1]} : vector<8x128xf32> to vector<8x32xf32>
    %174 = arith.mulf %171, %159 : vector<8x32xf32>
    %175 = arith.mulf %170, %172 : vector<8x32xf32>
    %176 = arith.addf %174, %175 : vector<8x32xf32>
    %177 = math.tanh %176 : vector<8x32xf32>
    %178 = arith.mulf %173, %177 : vector<8x32xf32>
    %c6_i32 = arith.constant 6 : i32
    %179 = vector.broadcast %c6_i32 : i32 to vector<8x1xi32>
    %180 = arith.cmpi sgt, %14, %179 : vector<8x1xi32>
    %181 = vector.shape_cast %180 : vector<8x1xi1> to vector<8x1xi1>
    %182 = vector.broadcast %181 : vector<8x1xi1> to vector<8x32xi1>
    %183 = arith.select %182, %176, %159 : vector<8x32xi1>, vector<8x32xf32>
    %184 = arith.select %182, %178, %160 : vector<8x32xi1>, vector<8x32xf32>
    %185 = vector.extract_strided_slice %12 {offsets = [56, 0], sizes = [8, 128], strides = [1, 1]} : vector<64x128xf32> to vector<8x128xf32>
    %cst_28 = arith.constant dense<0.000000e+00> : vector<8x128xf32>
    %186 = tpu.matmul %184, %13, %cst_28 {dimension_numbers = #tpu.dot_dimension_numbers<[1], [0], [0], [1], [0, 0, 1, 1], [], []>} : vector<8x32xf32>, vector<32x128xf32>, vector<8x128xf32> -> vector<8x128xf32>
    %187 = arith.addf %185, %186 : vector<8x128xf32>
    %188 = arith.negf %187 : vector<8x128xf32>
    %189 = math.exp %188 : vector<8x128xf32>
    %cst_29 = arith.constant 1.000000e+00 : f32
    %190 = vector.broadcast %cst_29 : f32 to vector<8x128xf32>
    %191 = arith.addf %190, %189 : vector<8x128xf32>
    %192 = arith.divf %190, %191 : vector<8x128xf32>
    %193 = math.tanh %187 : vector<8x128xf32>
    %194 = vector.extract_strided_slice %192 {offsets = [0, 0], sizes = [8, 32], strides = [1, 1]} : vector<8x128xf32> to vector<8x32xf32>
    %195 = vector.extract_strided_slice %192 {offsets = [0, 32], sizes = [8, 32], strides = [1, 1]} : vector<8x128xf32> to vector<8x32xf32>
    %196 = vector.extract_strided_slice %193 {offsets = [0, 64], sizes = [8, 32], strides = [1, 1]} : vector<8x128xf32> to vector<8x32xf32>
    %197 = vector.extract_strided_slice %192 {offsets = [0, 96], sizes = [8, 32], strides = [1, 1]} : vector<8x128xf32> to vector<8x32xf32>
    %198 = arith.mulf %195, %183 : vector<8x32xf32>
    %199 = arith.mulf %194, %196 : vector<8x32xf32>
    %200 = arith.addf %198, %199 : vector<8x32xf32>
    %201 = math.tanh %200 : vector<8x32xf32>
    %202 = arith.mulf %197, %201 : vector<8x32xf32>
    %c7_i32 = arith.constant 7 : i32
    %203 = vector.broadcast %c7_i32 : i32 to vector<8x1xi32>
    %204 = arith.cmpi sgt, %14, %203 : vector<8x1xi32>
    %205 = vector.shape_cast %204 : vector<8x1xi1> to vector<8x1xi1>
    %206 = vector.broadcast %205 : vector<8x1xi1> to vector<8x32xi1>
    %207 = arith.select %206, %202, %184 : vector<8x32xi1>, vector<8x32xf32>
    %c0_30 = arith.constant 0 : index
    %c0_31 = arith.constant 0 : index
    %208 = vector.load %arg6[%c0_30, %c0_31] : memref<32x16xf32, #tpu.memory_space<vmem>>, vector<32x16xf32>
    %cst_32 = arith.constant dense<0.000000e+00> : vector<8x16xf32>
    %209 = tpu.matmul %207, %208, %cst_32 {dimension_numbers = #tpu.dot_dimension_numbers<[1], [0], [0], [1], [0, 0, 1, 1], [], []>} : vector<8x32xf32>, vector<32x16xf32>, vector<8x16xf32> -> vector<8x16xf32>
    %c0_33 = arith.constant 0 : index
    %c0_34 = arith.constant 0 : index
    %210 = vector.load %arg7[%c0_33, %c0_34] : memref<1x16xf32, #tpu.memory_space<vmem>>, vector<1x16xf32>
    %211 = vector.broadcast %210 : vector<1x16xf32> to vector<8x16xf32>
    %212 = arith.addf %209, %211 : vector<8x16xf32>
    %c0_35 = arith.constant 0 : index
    %c0_36 = arith.constant 0 : index
    %213 = vector.load %arg8[%c0_35, %c0_36] : memref<16x32xf32, #tpu.memory_space<vmem>>, vector<16x32xf32>
    %cst_37 = arith.constant dense<0.000000e+00> : vector<8x32xf32>
    %214 = tpu.matmul %212, %213, %cst_37 {dimension_numbers = #tpu.dot_dimension_numbers<[1], [0], [0], [1], [0, 0, 1, 1], [], []>} : vector<8x16xf32>, vector<16x32xf32>, vector<8x32xf32> -> vector<8x32xf32>
    %c0_38 = arith.constant 0 : index
    %c0_39 = arith.constant 0 : index
    %215 = vector.load %arg9[%c0_38, %c0_39] : memref<1x32xf32, #tpu.memory_space<vmem>>, vector<1x32xf32>
    %216 = vector.broadcast %215 : vector<1x32xf32> to vector<8x32xf32>
    %217 = arith.addf %214, %216 : vector<8x32xf32>
    %cst_40 = arith.constant 0.000000e+00 : f32
    %218 = vector.broadcast %cst_40 : f32 to vector<8x32xf32>
    %219 = arith.maximumf %217, %218 : vector<8x32xf32>
    %c0_41 = arith.constant 0 : index
    %c0_42 = arith.constant 0 : index
    %220 = vector.load %arg10[%c0_41, %c0_42] : memref<32x2xf32, #tpu.memory_space<vmem>>, vector<32x2xf32>
    %cst_43 = arith.constant dense<0.000000e+00> : vector<8x2xf32>
    %221 = tpu.matmul %219, %220, %cst_43 {dimension_numbers = #tpu.dot_dimension_numbers<[1], [0], [0], [1], [0, 0, 1, 1], [], []>} : vector<8x32xf32>, vector<32x2xf32>, vector<8x2xf32> -> vector<8x2xf32>
    %c0_44 = arith.constant 0 : index
    %c0_45 = arith.constant 0 : index
    %222 = vector.load %arg11[%c0_44, %c0_45] : memref<1x2xf32, #tpu.memory_space<vmem>>, vector<1x2xf32>
    %223 = vector.broadcast %222 : vector<1x2xf32> to vector<8x2xf32>
    %224 = arith.addf %221, %223 : vector<8x2xf32>
    %225 = arith.negf %224 : vector<8x2xf32>
    %226 = math.exp %225 : vector<8x2xf32>
    %cst_46 = arith.constant 1.000000e+00 : f32
    %227 = vector.broadcast %cst_46 : f32 to vector<8x2xf32>
    %228 = arith.addf %227, %226 : vector<8x2xf32>
    %229 = arith.divf %227, %228 : vector<8x2xf32>
    %c0_47 = arith.constant 0 : index
    %c0_48 = arith.constant 0 : index
    %230 = vector.load %arg12[%c0_47, %c0_48] : memref<8x2xf32, #tpu.memory_space<vmem>>, vector<8x2xf32>
    tpu.vector_store %arg12[%c0_47, %c0_48], %229 {strides = array<i32>} : memref<8x2xf32, #tpu.memory_space<vmem>>, vector<8x2xf32>,
    return
  }
}

</mosaic_0001>

<bundles_post_ra>
// kernel: tpu_custom_call.1
= control target key start
LH: loop header
LB: loop body
LE: loop exit
PB: predicated region body
PF: predicated region fallthrough
CT: control target
= control target key end

     0   :  { %v1058_v0 = vmov 0   ;;  %v49_v19 = vlaneseq  ;;  %vm103_vm6 = vcmask 261120   ;;  %v1059_v22 = vmov 0.0   ;;  %s1060_s18 = smov 64   ;;  %s1419_s0 = inlined_call_operand.vmem [shape: s32[64,1], index: 0, kind: input, shape index: {}]   ;;  %s1420_s1 = inlined_call_operand.vmem [shape: s32[8,1], index: 1, kind: input, shape index: {}]   ;;  %s1421_s2 = inlined_call_operand.vmem [shape: f32[32,16], index: 2, kind: input, shape index: {}]   ;;  %s1422_s5 = inlined_call_operand.vmem [shape: f32[1,128], index: 5, kind: input, shape index: {}]   ;;  %s1423_s3 = inlined_call_operand.vmem [shape: f32[16,128], index: 3, kind: input, shape index: {}]   ;;  %s1424_s4 = inlined_call_operand.vmem [shape: f32[32,128], index: 4, kind: input, shape index: {}]   ;;  %s1425_s7 = inlined_call_operand.vmem [shape: f32[1,16], index: 7, kind: input, shape index: {}]   ;;  %s1426_s6 = inlined_call_operand.vmem [shape: f32[32,16], index: 6, kind: input, shape index: {}]   ;;  %s1427_s8 = inlined_call_operand.vmem [shape: f32[16,32], index: 8, kind: input, shape index: {}]   ;;  %s1428_s9 = inlined_call_operand.vmem [shape: f32[1,32], index: 9, kind: input, shape index: {}]   ;;  %s1429_s10 = inlined_call_operand.vmem [shape: f32[32,2], index: 10, kind: input, shape index: {}]   ;;  %s1430_s11 = inlined_call_operand.vmem [shape: f32[1,2], index: 11, kind: input, shape index: {}]   ;;  %s1431_s12 = inlined_call_operand.vmem [shape: f32[8,2], index: 12, kind: output, shape index: {}]  }
   0x1   :  { %983 = vset.pattern.permute.xlu0 %v1058_v0  ;;  %v48_v1 = vld [vmem:[%s1419_s0 + $0x38] sm:$0xff]  ;;  %984 = vset.pattern.permute.xlu1 %v1058_v0  ;;  %v41_v2 = vld [vmem:[%s1419_s0] sm:$0xff]  ;;  %v43_v5 = vld [vmem:[%s1419_s0 + $0x10] sm:$0xff]  ;;  %vm175_vm9 = vcmask 130048  }
   0x2   :  { %73 = vperm.xlu0 %983, %v48_v1   ;;  %985 = vset.pattern.permute.xlu2 %v1058_v0  ;;  %v1139_v3 = vld [vmem:[%s1420_s1] sm:$0xff]  ;;  %v44_v7 = vld [vmem:[%s1419_s0 + $0x18] sm:$0xff]  ;;  %v101_v12 = vld [vmem:[%s1421_s2 + $0x10] sm:$0xff]  ;;  %v1180_v20 = vand.u32 127, %v49_v19 }
   0x3   :  { %vm307_vm0 = vcmp.gt.s32.totalorder %v1139_v3, 0  ;;  %vm378_vm1 = vcmp.gt.s32.totalorder %v1139_v3, 1  ;;  %vm449_vm2 = vcmp.gt.s32.totalorder %v1139_v3, 2  ;;  %v45_v9 = vld [vmem:[%s1419_s0 + $0x20] sm:$0xff]  ;;  %vm520_vm3 = vcmp.gt.s32.totalorder %v1139_v3, 3  ;;  %v102_v11 = vld [vmem:[%s1421_s2 + $0x18] sm:$0xff] }
   0x4   :  { %v308_v4 = vsel %vm307_vm0, 1, %v1058_v0  ;;  %v379_v6 = vsel %vm378_vm1, 1, %v1058_v0  ;;  %v450_v8 = vsel %vm449_vm2, 1, %v1058_v0  ;;  %v521_v10 = vsel %vm520_vm3, 1, %v1058_v0  ;;  %973 = vmatpush.msra.mxu3 %v102_v11  ;;  %140 = vmatpush.msra.mxu0 %v102_v11  ;;  %v100_v13 = vld [vmem:[%s1421_s2 + $0x8] sm:$0xff]  ;;  %v99_v16 = vld [vmem:[%s1421_s2] sm:$0xff] }
   0x5   :  { %v46_v14 = vld [vmem:[%s1419_s0 + $0x28] sm:$0xff]  ;;  %vm591_vm4 = vcmp.gt.s32.totalorder %v1139_v3, 4  ;;  %v47_v17 = vld [vmem:[%s1419_s0 + $0x30] sm:$0xff]  ;;  %vm662_vm5 = vcmp.gt.s32.totalorder %v1139_v3, 5  ;;  %v169_v27 = vld [vmem:[%s1423_s3] sm:$0xff] }
   0x6   :  { %974 = vmatpush.msra.mxu3 %v101_v12  ;;  %141 = vmatpush.msra.mxu0 %v101_v12  ;;  %v592_v15 = vsel %vm591_vm4, 1, %v1058_v0  ;;  %v663_v18 = vsel %vm662_vm5, 1, %v1058_v0  ;;  %v170_v26 = vld [vmem:[%s1423_s3 + $0x8] sm:$0xff]  ;;  %v1197_v28 = vld [vmem:[%s1424_s4 + $0x18] sm:$0xff]  ;;  %v1204_v29 = vld [vmem:[%s1424_s4 + $0x10] sm:$0xff] }
   0x7   :  { %977 = vmatpush.msra.mxu2 %v170_v26  ;;  %214 = vmatpush.msra.mxu1 %v170_v26  ;;  %v1209_v30 = vld [vmem:[%s1424_s4 + $0x8] sm:$0xff]  ;;  %v1216_v31 = vld [vmem:[%s1424_s4] sm:$0xff] }
   0x8   :  { %975 = vmatpush.msra.mxu3 %v100_v13  ;;  %142 = vmatpush.msra.mxu0 %v100_v13  ;;  %v1242_v35 = vld [vmem:[%s1422_s5] ss:$0 sm:$0xff]  ;;  %v42_v41 = vld [vmem:[%s1419_s0 + $0x8] sm:$0xff]  ;;  %s1061_s0 = smov 32  }
   0x9   :  { %978 = vmatpush.msra.mxu2 %v169_v27  ;;  %215 = vmatpush.msra.mxu1 %v169_v27 }
   0xa   :  { %52 = vperm.xlu0 %983, %v41_v2   ;;  %976 = vmatpush.msra.mxu3 %v99_v16 }
   0xb   :  { %143 = vmatpush.msra.mxu0 %v99_v16  ;;  %261 = vmatpush.msrb.mxu2 %v1197_v28 }
   0xc   :  { %332 = vmatpush.msrb.mxu3 %v1197_v28 }
   0xd   :  { %262 = vmatpush.msrb.mxu2 %v1204_v29 }
   0xe   :  { %333 = vmatpush.msrb.mxu3 %v1204_v29 }
   0xf   :  { %263 = vmatpush.msrb.mxu2 %v1209_v30 }
  0x10   :  { %334 = vmatpush.msrb.mxu3 %v1209_v30 }
  0x11   :  { %264 = vmatpush.msrb.mxu2 %v1216_v31 }
  0x12   :  { %310 = vperm.xlu0 %983, %v308_v4   ;;  %335 = vmatpush.msrb.mxu3 %v1216_v31 }
  0x1a   :  { %58 = vperm.xlu0 %983, %v43_v5  }
  0x22   :  { %381 = vperm.xlu0 %983, %v379_v6  }
  0x2a   :  { %61 = vperm.xlu0 %983, %v44_v7  }
  0x32   :  { %452 = vperm.xlu0 %983, %v450_v8  }
  0x3a   :  { %64 = vperm.xlu0 %983, %v45_v9  }
  0x42   :  { %523 = vperm.xlu0 %983, %v521_v10  }
  0x4a   :  { %67 = vperm.xlu0 %983, %v46_v14  }
  0x52   :  { %594 = vperm.xlu0 %983, %v592_v15  }
  0x5a   :  { %70 = vperm.xlu0 %983, %v47_v17  }
  0x62   :  { %665 = vperm.xlu0 %983, %v663_v18  }
  0x74   :  { %v74_v21 = vpop.permute.xlu0 %73 }
  0x75   :  { %vm82_vm7 = vcmp.eq.s32.totalorder %v74_v21, %v1180_v20 }
  0x76   :  { %v937_v23 = vsel %vm82_vm7, 1.0, %v1059_v22 }
  0x77   :  { %945 = vmatmul.msk.f32.vlgmr.msra.gmra.mxu3 %vm103_vm6, %v937_v23 }
  0x78   :  { %474 = vmatpush.msra.mxu3 %v1197_v28 }
  0x7a   :  { %475 = vmatpush.msra.mxu3 %v1204_v29 }
  0x7c   :  { %v53_v24 = vpop.permute.xlu0 %52  ;;  %476 = vmatpush.msra.mxu3 %v1209_v30 }
  0x7d   :  { %vm75_vm8 = vcmp.eq.s32.totalorder %v53_v24, %v1180_v20 }
  0x7e   :  { %v930_v25 = vsel %vm75_vm8, 1.0, %v1059_v22  ;;  %477 = vmatpush.msra.mxu3 %v1216_v31 }
  0x7f   :  { %938 = vmatmul.msk.f32.vlgmr.msra.gmra.mxu0 %vm103_vm6, %v930_v25 }
  0x84   :  { %v1249_v42 = vpop.permute.xlu0 %310 }
  0x85   :  { %vm312_vm4 = vcmp.eq.s32.totalorder %v1249_v42, 1 }
  0x8c   :  { %v59_v44 = vpop.permute.xlu0 %58 }
  0x8d   :  { %vm77_vm15 = vcmp.eq.s32.totalorder %v59_v44, %v1180_v20 }
  0x8e   :  { %v932_v4 = vsel %vm77_vm15, 1.0, %v1059_v22 }
  0x94   :  { %v1251_v47 = vpop.permute.xlu0 %381 }
  0x9c   :  { %v62_v50 = vpop.permute.xlu0 %61 }
  0x9d   :  { %vm78_vm0 = vcmp.eq.s32.totalorder %v62_v50, %v1180_v20 }
  0x9e   :  { %v933_v6 = vsel %vm78_vm0, 1.0, %v1059_v22 }
  0xa4   :  { %v1253_v54 = vpop.permute.xlu0 %452 }
  0xa5   :  { %vm454_vm0 = vcmp.eq.s32.totalorder %v1253_v54, 1 }
  0xac   :  { %v65_v62 = vpop.permute.xlu0 %64 }
  0xad   :  { %vm79_vm1 = vcmp.eq.s32.totalorder %v65_v62, %v1180_v20 }
  0xae   :  { %v934_v7 = vsel %vm79_vm1, 1.0, %v1059_v22 }
  0xb4   :  { %v1259_v2 = vpop.permute.xlu0 %523 }
  0xbc   :  { %v68_v5 = vpop.permute.xlu0 %67 }
  0xbd   :  { %vm80_vm2 = vcmp.eq.s32.totalorder %v68_v5, %v1180_v20 }
  0xbe   :  { %v935_v9 = vsel %vm80_vm2, 1.0, %v1059_v22 }
  0xc4   :  { %v1269_v8 = vpop.permute.xlu0 %594 }
  0xcc   :  { %v71_v10 = vpop.permute.xlu0 %70 }
  0xcd   :  { %vm81_vm3 = vcmp.eq.s32.totalorder %v71_v10, %v1180_v20 }
  0xce   :  { %v936_v11 = vsel %vm81_vm3, 1.0, %v1059_v22 }
  0xfa   :  { %v166_v32 = vpop.f32.mrf.mxu3 }
  0xfb   :  { %953 = vmatmul.msk.f32.vlgmr.msra.gmra.mxu2 %vm175_vm9, %v166_v32 }
  0xfc   :  { %v145_v33 = vpop.f32.mrf.mxu0  ;;  %403 = vmatpush.msra.mxu2 %v1197_v28 }
  0xfd   :  { %946 = vmatmul.msk.f32.vlgmr.msra.gmra.mxu1 %vm175_vm9, %v145_v33 }
  0xfe   :  { %404 = vmatpush.msra.mxu2 %v1204_v29 }
 0x100   :  { %405 = vmatpush.msra.mxu2 %v1209_v30 }
 0x102   :  { %406 = vmatpush.msra.mxu2 %v1216_v31 }
 0x103   :  { %265 = vmatmul.f32.vlgmr.msrb.gmra.mxu2 %v1059_v22 }
 0x104   :  { %545 = vmatpush.msrb.mxu2 %v1197_v28 }
 0x106   :  { %546 = vmatpush.msrb.mxu2 %v1204_v29 }
 0x108   :  { %547 = vmatpush.msrb.mxu2 %v1209_v30 }
 0x10a   :  { %548 = vmatpush.msrb.mxu2 %v1216_v31 }
 0x17a   :  { %v217_v36 = vpop.f32.mrf.mxu1 }
 0x17b   :  { %v218_v37 = vadd.f32 %v1242_v35, %v217_v36 }
 0x17e   :  { %v1237_v34 = vpop.f32.mrf.mxu2 }
 0x186   :  { %v266_v38 = vpop.f32.mrf.mxu2 }
 0x187   :  { %v269_v39 = vadd.f32 %v266_v38, %v218_v37 }
 0x189   :  { %990 = vtanh.f32 %v269_v39  ;;  %v954_v43 = vmul.f32 -1.442695, %v269_v39 }
 0x18b   :  { %992 = vpow2.f32 %v954_v43 }
 0x18f   :  { %v991_v40 = vpop.eup %990 }
 0x190   :  { %292 = vrot.lane.b32.xlu1 %v991_v40, %s1060_s18 }
 0x191   :  { %v993_v45 = vpop.eup %992 }
 0x192   :  { %v273_v46 = vadd.f32 1.0, %v993_v45 }
 0x194   :  { %994 = vrcp.f32 %v273_v46  ;;  %v285_v55 = vand.u32 2147483648, %v273_v46  ;;  %vm279_vm11 = vweird.f32 %v273_v46  ;;  %v283_v56 = vand.u32 2147483647, %v273_v46 }
 0x196   :  { %v286_v58 = vor.u32 1.1754944e-38, %v285_v55  ;;  %vm284_vm13 = vcmp.eq.f32.partialorder %v283_v56, 8.507059e+37 }
 0x198   :  { %55 = vperm.xlu1 %984, %v42_v41  }
 0x19a   :  { %v995_v48 = vpop.eup %994 }
 0x19b   :  { %v275_v49 = vmul.f32 %v995_v48, %v273_v46  ;;  %vm280_vm10 = vweird.f32 %v995_v48 }
 0x19c   :  { %vm281_vm12 = vmor %vm279_vm11, %vm280_vm10  ;;  %vm383_vm11 = vcmp.eq.s32.totalorder %v1251_v47, 1 }
 0x19d   :  { %v276_v51 = vsub.f32 1.0, %v275_v49 }
 0x19f   :  { %v277_v52 = vmul.f32 %v995_v48, %v276_v51 }
 0x1a1   :  { %v278_v53 = vadd.f32 %v995_v48, %v277_v52 }
 0x1a3   :  { %v282_v57 = vsel %vm281_vm12, %v995_v48, %v278_v53 }
 0x1a4   :  { %v287_v60 = vsel %vm284_vm13, %v286_v58, %v282_v57 }
 0x1a5   :  { %v290_v12 = vmul.f32 0.0, %v287_v60 }
 0x202   :  { %v293_v59 = vpop.permute.xlu1 %292 }
 0x203   :  { %v295_v61 = vmul.f32 %v293_v59, %v287_v60 }
 0x205   :  { %297 = vrot.lane.b32.xlu2 %v295_v61, %s1061_s0 }
 0x20a   :  { %v56_v63 = vpop.permute.xlu1 %55 }
 0x20b   :  { %vm76_vm14 = vcmp.eq.s32.totalorder %v56_v63, %v1180_v20 }
 0x20c   :  { %v931_v1 = vsel %vm76_vm14, 1.0, %v1059_v22 }
 0x20d   :  { %939 = vmatmul.msk.f32.gmra.mxu0 %vm103_vm6, %v931_v1 }
 0x215   :  { %940 = vmatmul.msk.f32.gmra.mxu0 %vm103_vm6, %v932_v4 }
 0x21d   :  { %941 = vmatmul.msk.f32.gmra.mxu0 %vm103_vm6, %v933_v6 }
 0x225   :  { %942 = vmatmul.msk.f32.gmra.mxu0 %vm103_vm6, %v934_v7 }
 0x22d   :  { %943 = vmatmul.msk.f32.gmra.mxu0 %vm103_vm6, %v935_v9 }
 0x235   :  { %944 = vmatmul.msk.f32.gmra.mxu0 %vm103_vm6, %v936_v11 }
 0x25f   :  { %v298_v13 = vpop.permute.xlu2 %297 }
 0x260   :  { %v300_v14 = vadd.f32 %v298_v13, %v290_v12 }
 0x262   :  { %996 = vtanh.f32 %v300_v14  ;;  %v313_v55 = vsel %vm312_vm4, %v300_v14, 0.0 }
 0x268   :  { %v997_v15 = vpop.eup %996 }
 0x269   :  { %303 = vrot.lane.b32.xlu2 %v997_v15, %s1060_s18 }
 0x28a   :  { %v148_v16 = vpop.f32.mrf.mxu0 }
 0x28b   :  { %947 = vmatmul.msk.f32.gmra.mxu1 %vm175_vm9, %v148_v16 }
 0x292   :  { %v151_v17 = vpop.f32.mrf.mxu0 }
 0x293   :  { %948 = vmatmul.msk.f32.gmra.mxu1 %vm175_vm9, %v151_v17 }
 0x29a   :  { %v154_v18 = vpop.f32.mrf.mxu0 }
 0x29b   :  { %949 = vmatmul.msk.f32.gmra.mxu1 %vm175_vm9, %v154_v18 }
 0x2a2   :  { %v157_v19 = vpop.f32.mrf.mxu0 }
 0x2a3   :  { %950 = vmatmul.msk.f32.gmra.mxu1 %vm175_vm9, %v157_v19 }
 0x2aa   :  { %v160_v20 = vpop.f32.mrf.mxu0 }
 0x2ab   :  { %951 = vmatmul.msk.f32.gmra.mxu1 %vm175_vm9, %v160_v20 }
 0x2b2   :  { %v163_v21 = vpop.f32.mrf.mxu0 }
 0x2b3   :  { %952 = vmatmul.msk.f32.gmra.mxu1 %vm175_vm9, %v163_v21 }
 0x2c3   :  { %v304_v22 = vpop.permute.xlu2 %303 }
 0x2c4   :  { %v306_v23 = vmul.f32 %v304_v22, %v287_v60 }
 0x2c6   :  { %v314_v24 = vsel %vm312_vm4, %v306_v23, 0.0 }
 0x2c7   :  { %316 = vrot.lane.b32.xlu1 %v314_v24, %s1061_s0 }
 0x308   :  { %v220_v26 = vpop.f32.mrf.mxu1 }
 0x309   :  { %v221_v27 = vadd.f32 %v1242_v35, %v220_v26 }
 0x310   :  { %v223_v42 = vpop.f32.mrf.mxu1 }
 0x311   :  { %v224_v1 = vadd.f32 %v1242_v35, %v223_v42 }
 0x318   :  { %v226_v47 = vpop.f32.mrf.mxu1 }
 0x320   :  { %v229_v54 = vpop.f32.mrf.mxu1 }
 0x339   :  { %v317_v25 = vpop.permute.xlu1 %316 }
 0x33a   :  { %955 = vmatmul.msk.f32.vlgmr.msrb.gmra.mxu3 %vm103_vm6, %v317_v25 }
 0x33b   :  { %616 = vmatpush.msrb.mxu3 %v1197_v28 }
 0x33d   :  { %617 = vmatpush.msrb.mxu3 %v1204_v29 }
 0x33f   :  { %618 = vmatpush.msrb.mxu3 %v1209_v30 }
 0x341   :  { %619 = vmatpush.msrb.mxu3 %v1216_v31 }
 0x3bd   :  { %v337_v32 = vpop.f32.mrf.mxu3 }
 0x3be   :  { %v340_v33 = vadd.f32 %v337_v32, %v221_v27 }
 0x3c0   :  { %998 = vtanh.f32 %v340_v33  ;;  %v956_v37 = vmul.f32 -1.442695, %v340_v33 }
 0x3c2   :  { %1000 = vpow2.f32 %v956_v37 }
 0x3c6   :  { %v999_v36 = vpop.eup %998 }
 0x3c7   :  { %363 = vrot.lane.b32.xlu2 %v999_v36, %s1060_s18 }
 0x3c8   :  { %v1001_v38 = vpop.eup %1000 }
 0x3c9   :  { %v344_v39 = vadd.f32 1.0, %v1001_v38  ;;  %v227_v38 = vadd.f32 %v1242_v35, %v226_v47 }
 0x3cb   :  { %1002 = vrcp.f32 %v344_v39  ;;  %v356_v46 = vand.u32 2147483648, %v344_v39  ;;  %vm350_vm7 = vweird.f32 %v344_v39  ;;  %v354_v48 = vand.u32 2147483647, %v344_v39 }
 0x3cd   :  { %v357_v50 = vor.u32 1.1754944e-38, %v356_v46  ;;  %vm355_vm10 = vcmp.eq.f32.partialorder %v354_v48, 8.507059e+37 }
 0x3d1   :  { %v1003_v40 = vpop.eup %1002 }
 0x3d2   :  { %v346_v41 = vmul.f32 %v1003_v40, %v344_v39  ;;  %vm351_vm5 = vweird.f32 %v1003_v40 }
 0x3d3   :  { %vm352_vm8 = vmor %vm350_vm7, %vm351_vm5  ;;  %vm525_vm5 = vcmp.eq.s32.totalorder %v1259_v2, 1  ;;  %v232_v2 = vpop.f32.mrf.mxu1 }
 0x3d4   :  { %v347_v43 = vsub.f32 1.0, %v346_v41  ;;  %v233_v47 = vadd.f32 %v1242_v35, %v232_v2 }
 0x3d6   :  { %v348_v44 = vmul.f32 %v1003_v40, %v347_v43 }
 0x3d8   :  { %v349_v45 = vadd.f32 %v1003_v40, %v348_v44 }
 0x3da   :  { %v353_v49 = vsel %vm352_vm8, %v1003_v40, %v349_v45 }
 0x3db   :  { %v358_v52 = vsel %vm355_vm10, %v357_v50, %v353_v49 }
 0x3dc   :  { %v361_v56 = vmul.f32 %v358_v52, %v313_v55 }
 0x421   :  { %v364_v51 = vpop.permute.xlu2 %363 }
 0x422   :  { %v366_v53 = vmul.f32 %v364_v51, %v358_v52 }
 0x424   :  { %368 = vrot.lane.b32.xlu1 %v366_v53, %s1061_s0 }
 0x496   :  { %v369_v57 = vpop.permute.xlu1 %368 }
 0x497   :  { %v371_v58 = vadd.f32 %v369_v57, %v361_v56 }
 0x499   :  { %1004 = vtanh.f32 %v371_v58  ;;  %v384_v23 = vsel %vm383_vm11, %v371_v58, %v313_v55 }
 0x49f   :  { %v1005_v59 = vpop.eup %1004 }
 0x4a0   :  { %374 = vrot.lane.b32.xlu2 %v1005_v59, %s1060_s18 }
 0x4fa   :  { %v375_v60 = vpop.permute.xlu2 %374 }
 0x4fb   :  { %v377_v61 = vmul.f32 %v375_v60, %v358_v52 }
 0x4fd   :  { %v385_v62 = vsel %vm383_vm11, %v377_v61, %v314_v24 }
 0x4fe   :  { %387 = vrot.lane.b32.xlu1 %v385_v62, %s1061_s0 }
 0x570   :  { %v388_v63 = vpop.permute.xlu1 %387 }
 0x571   :  { %957 = vmatmul.msk.f32.vlgmr.msra.gmra.mxu2 %vm103_vm6, %v388_v63 }
 0x572   :  { %687 = vmatpush.msra.mxu2 %v1197_v28 }
 0x574   :  { %688 = vmatpush.msra.mxu2 %v1204_v29 }
 0x576   :  { %689 = vmatpush.msra.mxu2 %v1209_v30 }
 0x578   :  { %690 = vmatpush.msra.mxu2 %v1216_v31 }
 0x5f4   :  { %v408_v4 = vpop.f32.mrf.mxu2 }
 0x5f5   :  { %v411_v5 = vadd.f32 %v408_v4, %v224_v1  ;;  %v230_v1 = vadd.f32 %v1242_v35, %v229_v54 }
 0x5f7   :  { %1006 = vtanh.f32 %v411_v5  ;;  %v958_v7 = vmul.f32 -1.442695, %v411_v5 }
 0x5f9   :  { %1008 = vpow2.f32 %v958_v7 }
 0x5fd   :  { %v1007_v6 = vpop.eup %1006 }
 0x5fe   :  { %434 = vrot.lane.b32.xlu2 %v1007_v6, %s1060_s18 }
 0x5ff   :  { %v1009_v9 = vpop.eup %1008 }
 0x600   :  { %v415_v10 = vadd.f32 1.0, %v1009_v9 }
 0x602   :  { %1010 = vrcp.f32 %v415_v10  ;;  %v427_v16 = vand.u32 2147483648, %v415_v10  ;;  %vm421_vm13 = vweird.f32 %v415_v10  ;;  %v425_v17 = vand.u32 2147483647, %v415_v10 }
 0x604   :  { %v428_v19 = vor.u32 1.1754944e-38, %v427_v16  ;;  %vm426_vm15 = vcmp.eq.f32.partialorder %v425_v17, 8.507059e+37 }
 0x608   :  { %v1011_v11 = vpop.eup %1010 }
 0x609   :  { %v417_v12 = vmul.f32 %v1011_v11, %v415_v10  ;;  %vm422_vm12 = vweird.f32 %v1011_v11 }
 0x60a   :  { %vm423_vm14 = vmor %vm421_vm13, %vm422_vm12  ;;  %vm596_vm12 = vcmp.eq.s32.totalorder %v1269_v8, 1  ;;  %v235_v8 = vpop.f32.mrf.mxu1 }
 0x60b   :  { %v418_v13 = vsub.f32 1.0, %v417_v12  ;;  %v236_v54 = vadd.f32 %v1242_v35, %v235_v8  ;;  %v845_v8 = vld [vmem:[%s1427_s8 + $0x8] sm:$0xff] }
 0x60d   :  { %v419_v14 = vmul.f32 %v1011_v11, %v418_v13 }
 0x60f   :  { %v420_v15 = vadd.f32 %v1011_v11, %v419_v14 }
 0x611   :  { %v424_v18 = vsel %vm423_vm14, %v1011_v11, %v420_v15 }
 0x612   :  { %v429_v21 = vsel %vm426_vm15, %v428_v19, %v424_v18 }
 0x613   :  { %v432_v24 = vmul.f32 %v429_v21, %v384_v23 }
 0x658   :  { %v435_v20 = vpop.permute.xlu2 %434 }
 0x659   :  { %v437_v22 = vmul.f32 %v435_v20, %v429_v21 }
 0x65b   :  { %439 = vrot.lane.b32.xlu1 %v437_v22, %s1061_s0 }
 0x6cd   :  { %v440_v25 = vpop.permute.xlu1 %439 }
 0x6ce   :  { %v442_v26 = vadd.f32 %v440_v25, %v432_v24 }
 0x6d0   :  { %1012 = vtanh.f32 %v442_v26  ;;  %v455_v56 = vsel %vm454_vm0, %v442_v26, %v384_v23 }
 0x6d6   :  { %v1013_v27 = vpop.eup %1012 }
 0x6d7   :  { %445 = vrot.lane.b32.xlu2 %v1013_v27, %s1060_s18 }
 0x731   :  { %v446_v32 = vpop.permute.xlu2 %445 }
 0x732   :  { %v448_v33 = vmul.f32 %v446_v32, %v429_v21 }
 0x734   :  { %v456_v36 = vsel %vm454_vm0, %v448_v33, %v385_v62 }
 0x735   :  { %458 = vrot.lane.b32.xlu1 %v456_v36, %s1061_s0 }
 0x7a7   :  { %v459_v37 = vpop.permute.xlu1 %458 }
 0x7a8   :  { %959 = vmatmul.msk.f32.vlgmr.msra.gmra.mxu3 %vm103_vm6, %v459_v37 }
 0x7a9   :  { %758 = vmatpush.msra.mxu3 %v1197_v28 }
 0x7ab   :  { %759 = vmatpush.msra.mxu3 %v1204_v29 }
 0x7ad   :  { %760 = vmatpush.msra.mxu3 %v1209_v30 }
 0x7af   :  { %761 = vmatpush.msra.mxu3 %v1216_v31 }
 0x82b   :  { %v479_v39 = vpop.f32.mrf.mxu3 }
 0x82c   :  { %v482_v40 = vadd.f32 %v479_v39, %v227_v38 }
 0x82e   :  { %1014 = vtanh.f32 %v482_v40  ;;  %v960_v43 = vmul.f32 -1.442695, %v482_v40 }
 0x830   :  { %1016 = vpow2.f32 %v960_v43 }
 0x834   :  { %v1015_v41 = vpop.eup %1014 }
 0x835   :  { %505 = vrot.lane.b32.xlu2 %v1015_v41, %s1060_s18 }
 0x836   :  { %v1017_v44 = vpop.eup %1016 }
 0x837   :  { %v486_v45 = vadd.f32 1.0, %v1017_v44 }
 0x839   :  { %1018 = vrcp.f32 %v486_v45  ;;  %v498_v31 = vand.u32 2147483648, %v486_v45  ;;  %vm492_vm2 = vweird.f32 %v486_v45  ;;  %v496_v49 = vand.u32 2147483647, %v486_v45 }
 0x83b   :  { %v499_v51 = vor.u32 1.1754944e-38, %v498_v31  ;;  %vm497_vm4 = vcmp.eq.f32.partialorder %v496_v49, 8.507059e+37 }
 0x83f   :  { %v1019_v28 = vpop.eup %1018 }
 0x840   :  { %v488_v29 = vmul.f32 %v1019_v28, %v486_v45  ;;  %vm493_vm1 = vweird.f32 %v1019_v28 }
 0x841   :  { %vm494_vm3 = vmor %vm492_vm2, %vm493_vm1  ;;  %vm733_vm2 = vcmp.gt.s32.totalorder %v1139_v3, 6 }
 0x842   :  { %v489_v46 = vsub.f32 1.0, %v488_v29 }
 0x844   :  { %v490_v30 = vmul.f32 %v1019_v28, %v489_v46 }
 0x846   :  { %v491_v48 = vadd.f32 %v1019_v28, %v490_v30 }
 0x848   :  { %v495_v50 = vsel %vm494_vm3, %v1019_v28, %v491_v48 }
 0x849   :  { %v500_v53 = vsel %vm497_vm4, %v499_v51, %v495_v50 }
 0x84a   :  { %v503_v57 = vmul.f32 %v500_v53, %v455_v56 }
 0x88f   :  { %v506_v52 = vpop.permute.xlu2 %505 }
 0x890   :  { %v508_v55 = vmul.f32 %v506_v52, %v500_v53 }
 0x892   :  { %510 = vrot.lane.b32.xlu1 %v508_v55, %s1061_s0 }
 0x904   :  { %v511_v58 = vpop.permute.xlu1 %510 }
 0x905   :  { %v513_v59 = vadd.f32 %v511_v58, %v503_v57 }
 0x907   :  { %1020 = vtanh.f32 %v513_v59  ;;  %v526_v23 = vsel %vm525_vm5, %v513_v59, %v455_v56 }
 0x90d   :  { %v1021_v60 = vpop.eup %1020 }
 0x90e   :  { %516 = vrot.lane.b32.xlu2 %v1021_v60, %s1060_s18  ;;  %v666_v60 = vpop.permute.xlu0 %665 }
 0x90f   :  { %vm667_vm1 = vcmp.eq.s32.totalorder %v666_v60, 1  ;;  %v811_v60 = vld [vmem:[%s1426_s6] sm:$0xff] }
 0x968   :  { %v517_v61 = vpop.permute.xlu2 %516 }
 0x969   :  { %v519_v62 = vmul.f32 %v517_v61, %v500_v53 }
 0x96b   :  { %v527_v63 = vsel %vm525_vm5, %v519_v62, %v456_v36 }
 0x96c   :  { %529 = vrot.lane.b32.xlu1 %v527_v63, %s1061_s0 }
 0x9de   :  { %v530_v42 = vpop.permute.xlu1 %529 }
 0x9df   :  { %961 = vmatmul.msk.f32.vlgmr.msrb.gmra.mxu2 %vm103_vm6, %v530_v42 }
 0xa62   :  { %v550_v4 = vpop.f32.mrf.mxu2 }
 0xa63   :  { %v553_v5 = vadd.f32 %v550_v4, %v230_v1 }
 0xa65   :  { %1022 = vtanh.f32 %v553_v5  ;;  %v962_v7 = vmul.f32 -1.442695, %v553_v5 }
 0xa67   :  { %1024 = vpow2.f32 %v962_v7 }
 0xa6b   :  { %v1023_v6 = vpop.eup %1022 }
 0xa6c   :  { %576 = vrot.lane.b32.xlu2 %v1023_v6, %s1060_s18 }
 0xa6d   :  { %v1025_v9 = vpop.eup %1024 }
 0xa6e   :  { %v557_v10 = vadd.f32 1.0, %v1025_v9 }
 0xa70   :  { %1026 = vrcp.f32 %v557_v10  ;;  %v569_v16 = vand.u32 2147483648, %v557_v10  ;;  %vm563_vm8 = vweird.f32 %v557_v10  ;;  %v567_v17 = vand.u32 2147483647, %v557_v10 }
 0xa72   :  { %v570_v19 = vor.u32 1.1754944e-38, %v569_v16  ;;  %vm568_vm11 = vcmp.eq.f32.partialorder %v567_v17, 8.507059e+37 }
 0xa76   :  { %v1027_v11 = vpop.eup %1026 }
 0xa77   :  { %v559_v12 = vmul.f32 %v1027_v11, %v557_v10  ;;  %vm564_vm7 = vweird.f32 %v1027_v11  ;;  %v734_v10 = vsel %vm733_vm2, 1, %v1058_v0 }
 0xa78   :  { %vm565_vm10 = vmor %vm563_vm8, %vm564_vm7 }
 0xa79   :  { %v560_v13 = vsub.f32 1.0, %v559_v12 }
 0xa7b   :  { %v561_v14 = vmul.f32 %v1027_v11, %v560_v13 }
 0xa7d   :  { %v562_v15 = vadd.f32 %v1027_v11, %v561_v14 }
 0xa7f   :  { %v566_v18 = vsel %vm565_vm10, %v1027_v11, %v562_v15  ;;  %vm804_vm10 = vcmp.gt.s32.totalorder %v1139_v3, 7 }
 0xa80   :  { %v571_v21 = vsel %vm568_vm11, %v570_v19, %v566_v18 }
 0xa81   :  { %v574_v24 = vmul.f32 %v571_v21, %v526_v23 }
 0xac6   :  { %v577_v20 = vpop.permute.xlu2 %576 }
 0xac7   :  { %v579_v22 = vmul.f32 %v577_v20, %v571_v21 }
 0xac9   :  { %581 = vrot.lane.b32.xlu1 %v579_v22, %s1061_s0 }
 0xb3b   :  { %v582_v25 = vpop.permute.xlu1 %581 }
 0xb3c   :  { %v584_v26 = vadd.f32 %v582_v25, %v574_v24 }
 0xb3e   :  { %1028 = vtanh.f32 %v584_v26  ;;  %v597_v55 = vsel %vm596_vm12, %v584_v26, %v526_v23 }
 0xb44   :  { %v1029_v27 = vpop.eup %1028 }
 0xb45   :  { %587 = vrot.lane.b32.xlu2 %v1029_v27, %s1060_s18 }
 0xb9f   :  { %v588_v32 = vpop.permute.xlu2 %587 }
 0xba0   :  { %v590_v33 = vmul.f32 %v588_v32, %v571_v21 }
 0xba2   :  { %v598_v36 = vsel %vm596_vm12, %v590_v33, %v527_v63 }
 0xba3   :  { %600 = vrot.lane.b32.xlu1 %v598_v36, %s1061_s0 }
 0xc15   :  { %v601_v37 = vpop.permute.xlu1 %600 }
 0xc16   :  { %963 = vmatmul.msk.f32.vlgmr.msrb.gmra.mxu3 %vm103_vm6, %v601_v37 }
 0xc17   :  { %867 = vmatpush.msrb.mxu3 %v845_v8 }
 0xc99   :  { %v621_v38 = vpop.f32.mrf.mxu3 }
 0xc9a   :  { %v624_v39 = vadd.f32 %v621_v38, %v233_v47  ;;  %v239_v47 = vadd.f32 %v1242_v35, %v1237_v34 }
 0xc9c   :  { %1030 = vtanh.f32 %v624_v39  ;;  %v964_v41 = vmul.f32 -1.442695, %v624_v39 }
 0xc9e   :  { %1032 = vpow2.f32 %v964_v41  ;;  %v805_v41 = vsel %vm804_vm10, 1, %v1058_v0 }
 0xca2   :  { %v1031_v40 = vpop.eup %1030 }
 0xca3   :  { %647 = vrot.lane.b32.xlu2 %v1031_v40, %s1060_s18 }
 0xca4   :  { %v1033_v43 = vpop.eup %1032 }
 0xca5   :  { %v628_v44 = vadd.f32 1.0, %v1033_v43 }
 0xca7   :  { %1034 = vrcp.f32 %v628_v44  ;;  %v640_v48 = vand.u32 2147483648, %v628_v44  ;;  %vm634_vm14 = vweird.f32 %v628_v44  ;;  %v638_v31 = vand.u32 2147483647, %v628_v44 }
 0xca9   :  { %v641_v50 = vor.u32 1.1754944e-38, %v640_v48  ;;  %vm639_vm0 = vcmp.eq.f32.partialorder %v638_v31, 8.507059e+37 }
 0xcad   :  { %v1035_v45 = vpop.eup %1034 }
 0xcae   :  { %v630_v28 = vmul.f32 %v1035_v45, %v628_v44  ;;  %vm635_vm13 = vweird.f32 %v1035_v45 }
 0xcaf   :  { %vm636_vm15 = vmor %vm634_vm14, %vm635_vm13 }
 0xcb0   :  { %v631_v29 = vsub.f32 1.0, %v630_v28 }
 0xcb2   :  { %v632_v46 = vmul.f32 %v1035_v45, %v631_v29 }
 0xcb4   :  { %v633_v30 = vadd.f32 %v1035_v45, %v632_v46 }
 0xcb6   :  { %v637_v49 = vsel %vm636_vm15, %v1035_v45, %v633_v30 }
 0xcb7   :  { %v642_v52 = vsel %vm639_vm0, %v641_v50, %v637_v49 }
 0xcb8   :  { %v645_v56 = vmul.f32 %v642_v52, %v597_v55 }
 0xcfd   :  { %v648_v51 = vpop.permute.xlu2 %647 }
 0xcfe   :  { %v650_v53 = vmul.f32 %v648_v51, %v642_v52 }
 0xd00   :  { %652 = vrot.lane.b32.xlu1 %v650_v53, %s1061_s0 }
 0xd72   :  { %v653_v57 = vpop.permute.xlu1 %652 }
 0xd73   :  { %v655_v58 = vadd.f32 %v653_v57, %v645_v56  ;;  %v814_v57 = vld [vmem:[%s1426_s6 + $0x18] sm:$0xff] }
 0xd74   :  { %836 = vmatpush.msrb.mxu2 %v814_v57 }
 0xd75   :  { %1036 = vtanh.f32 %v655_v58  ;;  %v668_v23 = vsel %vm667_vm1, %v655_v58, %v597_v55  ;;  %v813_v58 = vld [vmem:[%s1426_s6 + $0x10] sm:$0xff] }
 0xd76   :  { %837 = vmatpush.msrb.mxu2 %v813_v58 }
 0xd7b   :  { %v1037_v59 = vpop.eup %1036 }
 0xd7c   :  { %658 = vrot.lane.b32.xlu2 %v1037_v59, %s1060_s18  ;;  %v812_v59 = vld [vmem:[%s1426_s6 + $0x8] sm:$0xff] }
 0xd7d   :  { %838 = vmatpush.msrb.mxu2 %v812_v59 }
 0xd7f   :  { %839 = vmatpush.msrb.mxu2 %v811_v60 }
 0xdd6   :  { %v659_v61 = vpop.permute.xlu2 %658 }
 0xdd7   :  { %v661_v62 = vmul.f32 %v659_v61, %v642_v52 }
 0xdd9   :  { %v669_v63 = vsel %vm667_vm1, %v661_v62, %v598_v36  ;;  %vm924_vm1 = vcmask 15360  }
 0xdda   :  { %671 = vrot.lane.b32.xlu1 %v669_v63, %s1061_s0 }
 0xe4c   :  { %v672_v42 = vpop.permute.xlu1 %671 }
 0xe4d   :  { %965 = vmatmul.msk.f32.vlgmr.msra.gmra.mxu2 %vm103_vm6, %v672_v42 }
 0xed0   :  { %v692_v1 = vpop.f32.mrf.mxu2 }
 0xed1   :  { %v695_v4 = vadd.f32 %v692_v1, %v236_v54  ;;  %v844_v54 = vld [vmem:[%s1427_s8] sm:$0xff] }
 0xed2   :  { %868 = vmatpush.msrb.mxu3 %v844_v54 }
 0xed3   :  { %1038 = vtanh.f32 %v695_v4  ;;  %v966_v6 = vmul.f32 -1.442695, %v695_v4  ;;  %v877_v4 = vld [vmem:[%s1429_s10 + $0x18] sm:$0xff] }
 0xed4   :  { %897 = vmatpush.msra.mxu2 %v877_v4 }
 0xed5   :  { %1040 = vpow2.f32 %v966_v6  ;;  %v987_v6 = vld [vmem:[%s1425_s7] ss:$0 sm:$0xff] }
 0xed9   :  { %v1039_v5 = vpop.eup %1038 }
 0xeda   :  { %718 = vrot.lane.b32.xlu2 %v1039_v5, %s1060_s18  ;;  %v876_v5 = vld [vmem:[%s1429_s10 + $0x10] sm:$0xff] }
 0xedb   :  { %v1041_v7 = vpop.eup %1040  ;;  %898 = vmatpush.msra.mxu2 %v876_v5 }
 0xedc   :  { %v699_v9 = vadd.f32 1.0, %v1041_v7 }
 0xede   :  { %1042 = vrcp.f32 %v699_v9  ;;  %v711_v16 = vand.u32 2147483648, %v699_v9  ;;  %vm705_vm4 = vweird.f32 %v699_v9  ;;  %v709_v17 = vand.u32 2147483647, %v699_v9 }
 0xee0   :  { %v712_v19 = vor.u32 1.1754944e-38, %v711_v16  ;;  %vm710_vm7 = vcmp.eq.f32.partialorder %v709_v17, 8.507059e+37  ;;  %v989_v16 = vld [vmem:[%s1430_s11] ss:$0 sm:$0xff] }
 0xee2   :  { %736 = vperm.xlu2 %985, %v734_v10   ;;  %v875_v10 = vld [vmem:[%s1429_s10 + $0x8] sm:$0xff] }
 0xee3   :  { %899 = vmatpush.msra.mxu2 %v875_v10 }
 0xee4   :  { %v1043_v11 = vpop.eup %1042 }
 0xee5   :  { %v701_v12 = vmul.f32 %v1043_v11, %v699_v9  ;;  %vm706_vm3 = vweird.f32 %v1043_v11 }
 0xee6   :  { %vm707_vm5 = vmor %vm705_vm4, %vm706_vm3 }
 0xee7   :  { %v702_v13 = vsub.f32 1.0, %v701_v12  ;;  %v988_v12 = vld [vmem:[%s1428_s9] ss:$0 sm:$0xff] }
 0xee9   :  { %v703_v14 = vmul.f32 %v1043_v11, %v702_v13 }
 0xeeb   :  { %v704_v15 = vadd.f32 %v1043_v11, %v703_v14 }
 0xeed   :  { %v708_v18 = vsel %vm707_vm5, %v1043_v11, %v704_v15  ;;  %v874_v11 = vld [vmem:[%s1429_s10] sm:$0xff] }
 0xeee   :  { %v713_v21 = vsel %vm710_vm7, %v712_v19, %v708_v18  ;;  %900 = vmatpush.msra.mxu2 %v874_v11 }
 0xeef   :  { %v716_v24 = vmul.f32 %v713_v21, %v668_v23 }
 0xf34   :  { %v719_v20 = vpop.permute.xlu2 %718 }
 0xf35   :  { %v721_v22 = vmul.f32 %v719_v20, %v713_v21 }
 0xf37   :  { %723 = vrot.lane.b32.xlu0 %v721_v22, %s1061_s0 }
 0xf3c   :  { %v737_v32 = vpop.permute.xlu2 %736 }
 0xf3d   :  { %vm738_vm8 = vcmp.eq.s32.totalorder %v737_v32, 1 }
 0xfa9   :  { %v724_v25 = vpop.permute.xlu0 %723 }
 0xfaa   :  { %v726_v26 = vadd.f32 %v724_v25, %v716_v24 }
 0xfac   :  { %1044 = vtanh.f32 %v726_v26  ;;  %v739_v51 = vsel %vm738_vm8, %v726_v26, %v668_v23 }
 0xfb2   :  { %v1045_v27 = vpop.eup %1044 }
 0xfb3   :  { %729 = vrot.lane.b32.xlu1 %v1045_v27, %s1060_s18 }
0x1025   :  { %v730_v33 = vpop.permute.xlu1 %729 }
0x1026   :  { %v732_v36 = vmul.f32 %v730_v33, %v713_v21 }
0x1028   :  { %v740_v37 = vsel %vm738_vm8, %v732_v36, %v669_v63 }
0x1029   :  { %742 = vrot.lane.b32.xlu0 %v740_v37, %s1061_s0 }
0x109b   :  { %v743_v2 = vpop.permute.xlu0 %742 }
0x109c   :  { %967 = vmatmul.msk.f32.vlgmr.msra.gmra.mxu3 %vm103_vm6, %v743_v2 }
0x111f   :  { %v763_v38 = vpop.f32.mrf.mxu3 }
0x1120   :  { %v766_v39 = vadd.f32 %v763_v38, %v239_v47 }
0x1122   :  { %1046 = vtanh.f32 %v766_v39  ;;  %v968_v43 = vmul.f32 -1.442695, %v766_v39 }
0x1124   :  { %1048 = vpow2.f32 %v968_v43 }
0x1128   :  { %v1047_v40 = vpop.eup %1046 }
0x1129   :  { %789 = vrot.lane.b32.xlu1 %v1047_v40, %s1060_s18 }
0x112a   :  { %v1049_v44 = vpop.eup %1048 }
0x112b   :  { %v770_v45 = vadd.f32 1.0, %v1049_v44 }
0x112d   :  { %1050 = vrcp.f32 %v770_v45  ;;  %v782_v30 = vand.u32 2147483648, %v770_v45  ;;  %vm776_vm12 = vweird.f32 %v770_v45  ;;  %v780_v48 = vand.u32 2147483647, %v770_v45 }
0x112f   :  { %v783_v3 = vor.u32 1.1754944e-38, %v782_v30  ;;  %vm781_vm14 = vcmp.eq.f32.partialorder %v780_v48, 8.507059e+37 }
0x1131   :  { %807 = vperm.xlu1 %984, %v805_v41  }
0x1133   :  { %v1051_v28 = vpop.eup %1050 }
0x1134   :  { %v772_v29 = vmul.f32 %v1051_v28, %v770_v45  ;;  %vm777_vm11 = vweird.f32 %v1051_v28 }
0x1135   :  { %vm778_vm13 = vmor %vm776_vm12, %vm777_vm11 }
0x1136   :  { %v773_v46 = vsub.f32 1.0, %v772_v29 }
0x1138   :  { %v774_v34 = vmul.f32 %v1051_v28, %v773_v46 }
0x113a   :  { %v775_v35 = vadd.f32 %v1051_v28, %v774_v34 }
0x113c   :  { %v779_v31 = vsel %vm778_vm13, %v1051_v28, %v775_v35 }
0x113d   :  { %v784_v49 = vsel %vm781_vm14, %v783_v3, %v779_v31 }
0x113e   :  { %v787_v52 = vmul.f32 %v784_v49, %v739_v51 }
0x119b   :  { %v790_v0 = vpop.permute.xlu1 %789 }
0x119c   :  { %v792_v50 = vmul.f32 %v790_v0, %v784_v49 }
0x119e   :  { %794 = vrot.lane.b32.xlu2 %v792_v50, %s1061_s0 }
0x11a3   :  { %v808_v61 = vpop.permute.xlu1 %807 }
0x11a4   :  { %vm809_vm15 = vcmp.eq.s32.totalorder %v808_v61, 1 }
0x11f8   :  { %v795_v53 = vpop.permute.xlu2 %794 }
0x11f9   :  { %v797_v55 = vadd.f32 %v795_v53, %v787_v52 }
0x11fb   :  { %1052 = vtanh.f32 %v797_v55 }
0x1201   :  { %v1053_v56 = vpop.eup %1052 }
0x1202   :  { %800 = vrot.lane.b32.xlu0 %v1053_v56, %s1060_s18 }
0x1274   :  { %v801_v62 = vpop.permute.xlu0 %800 }
0x1275   :  { %v803_v63 = vmul.f32 %v801_v62, %v784_v49 }
0x1277   :  { %v810_v42 = vsel %vm809_vm15, %v803_v63, %v740_v37 }
0x1278   :  { %820 = vrot.lane.b32.xlu2 %v810_v42, %s1061_s0 }
0x12d2   :  { %v821_v1 = vpop.permute.xlu2 %820 }
0x12d3   :  { %969 = vmatmul.msk.f32.vlgmr.msrb.gmra.mxu2 %vm103_vm6, %v821_v1 }
0x1356   :  { %v841_v7 = vpop.f32.mrf.mxu2 }
0x1357   :  { %v842_v9 = vadd.f32 %v987_v6, %v841_v7 }
0x1359   :  { %970 = vmatmul.msk.f32.vlgmr.msrb.gmra.mxu3 %vm175_vm9, %v842_v9 }
0x13dc   :  { %v870_v13 = vpop.f32.mrf.mxu3 }
0x13dd   :  { %v871_v14 = vadd.f32 %v988_v12, %v870_v13 }
0x13df   :  { %v873_v15 = vmax.f32 %v871_v14, 0.0 }
0x13e1   :  { %971 = vmatmul.msk.f32.vlgmr.msra.gmra.mxu2 %vm103_vm6, %v873_v15 }
0x1464   :  { %v902_v17 = vpop.f32.mrf.mxu2 }
0x1465   :  { %v903_v18 = vadd.f32 %v989_v16, %v902_v17 }
0x1467   :  { %v972_v19 = vmul.f32 -1.442695, %v903_v18 }
0x1469   :  { %1054 = vpow2.f32 %v972_v19 }
0x146f   :  { %v1055_v20 = vpop.eup %1054 }
0x1470   :  { %v908_v21 = vadd.f32 1.0, %v1055_v20 }
0x1472   :  { %1056 = vrcp.f32 %v908_v21  ;;  %v920_v25 = vand.u32 2147483648, %v908_v21  ;;  %v918_v27 = vand.u32 2147483647, %v908_v21  ;;  %vm914_vm6 = vweird.f32 %v908_v21 }
0x1474   :  { %v921_v33 = vor.u32 1.1754944e-38, %v920_v25  ;;  %vm919_vm2 = vcmp.eq.f32.partialorder %v918_v27, 8.507059e+37 }
0x1478   :  { %v1057_v22 = vpop.eup %1056 }
0x1479   :  { %v910_v23 = vmul.f32 %v1057_v22, %v908_v21  ;;  %vm915_vm9 = vweird.f32 %v1057_v22 }
0x147a   :  { %vm916_vm0 = vmor %vm914_vm6, %vm915_vm9 }
0x147b   :  { %v911_v24 = vsub.f32 1.0, %v910_v23 }
0x147d   :  { %v912_v26 = vmul.f32 %v1057_v22, %v911_v24 }
0x147f   :  { %v913_v32 = vadd.f32 %v1057_v22, %v912_v26 }
0x1481   :  { %v917_v36 = vsel %vm916_vm0, %v1057_v22, %v913_v32 }
0x1482   :  { %v922_v37 = vsel %vm919_vm2, %v921_v33, %v917_v36 }
0x1483   :  { %925 = vst.msk [vmem:[%s1431_s12] sm:$0xff] %vm924_vm1, %v922_v37 }

</bundles_post_ra>
